<compile_context>
chip_gen: v7x
topology: tpu7x:2x2x1
jax: 0.10.0
libtpu: 0.0.40
codegen_flags: <defaults>
</compile_context>

<pallas_src>
import functools

import jax
import jax.numpy as jnp
from jax import lax
from jax.experimental import pallas as pl
from jax.experimental.pallas import tpu as pltpu


# Contract the last (feature) dim of both operands: A (m, k), B (n, k) -> A @ B^T.
_NT_DIMS = (((1,), (1,)), ((), ()))


def _coral_gram_kernel(s_ref, t_ref, ss_ref, tt_ref, st_ref, *, precision):
    """Accumulate G_ss, G_tt, G_st over tD-wide feature blocks (grid axis 1)."""
    k = pl.program_id(1)

    @pl.when(k == 0)
    def _():
        ss_ref[...] = jnp.zeros_like(ss_ref)
        tt_ref[...] = jnp.zeros_like(tt_ref)
        st_ref[...] = jnp.zeros_like(st_ref)

    s = s_ref[...]
    t = t_ref[...]
    ss_ref[...] += lax.dot_general(s, s, _NT_DIMS, precision=precision,
                                   preferred_element_type=jnp.float32)
    tt_ref[...] += lax.dot_general(t, t, _NT_DIMS, precision=precision,
                                   preferred_element_type=jnp.float32)
    st_ref[...] += lax.dot_general(s, t, _NT_DIMS, precision=precision,
                                   preferred_element_type=jnp.float32)


def coral_loss(source, target, *, tile_d=None):
    """CORAL loss matching the PyTorch reference forward pass."""
    n_s = source.shape[0]
    n_t = target.shape[0]
    d_chan = source.shape[1]          # the `d` used by the 1/(4 d^2) normalizer

    s2 = source.reshape(n_s, -1)
    t2 = target.reshape(n_t, -1)
    assert s2.shape[1] == t2.shape[1], "flattened feature dims must match"
    D = s2.shape[1]
    itemsize = s2.dtype.itemsize
    rows = n_s + n_t

    # ---- feature-block width tD -------------------------------------------
    if tile_d is not None:
        tD = int(min(tile_d, D))
    else:
        # Keep double-buffered (rows, tD) input blocks under ~8 MiB.
        cap = (8 * 1024 * 1024) // max(1, 2 * rows * itemsize)
        if D <= 2048 and D <= cap:
            tD = D                      # single block; block == full dim
        else:
            tD = int(min(4096, max(128, min(cap, D))))

    if tD < D:
        tD = max(128, (tD // 128) * 128)   # lane-dim blocks must be 128-aligned
        n_blk = (D + tD - 1) // tD
    else:
        tD = D
        n_blk = 1

    D_pad = n_blk * tD
    if D_pad != D:
        # Zero feature columns contribute exactly zero to every gram.
        pad = [(0, 0), (0, D_pad - D)]
        s2 = jnp.pad(s2, pad)
        t2 = jnp.pad(t2, pad)

    # Split the reduction into n_par independent partial-gram ranges so the
    # leading grid axis can be "parallel" (v7x megacore); exact after summing.
    n_par = 2 if (n_blk >= 2 and n_blk % 2 == 0) else 1
    kpp = n_blk // n_par

    precision = lax.Precision.HIGHEST if s2.dtype == jnp.float32 else None

    out_ss, out_tt, out_st = pl.pallas_call(
        functools.partial(_coral_gram_kernel, precision=precision),
        out_shape=(
            jax.ShapeDtypeStruct((n_par, n_s, n_s), jnp.float32),
            jax.ShapeDtypeStruct((n_par, n_t, n_t), jnp.float32),
            jax.ShapeDtypeStruct((n_par, n_s, n_t), jnp.float32),
        ),
        grid_spec=pltpu.PrefetchScalarGridSpec(
            num_scalar_prefetch=0,
            grid=(n_par, kpp),
            in_specs=[
                pl.BlockSpec((n_s, tD), lambda p, k: (0, p * kpp + k)),
                pl.BlockSpec((n_t, tD), lambda p, k: (0, p * kpp + k)),
            ],
            out_specs=(
                pl.BlockSpec((None, n_s, n_s), lambda p, k: (p, 0, 0)),
                pl.BlockSpec((None, n_t, n_t), lambda p, k: (p, 0, 0)),
                pl.BlockSpec((None, n_s, n_t), lambda p, k: (p, 0, 0)),
            ),
        ),
        compiler_params=pltpu.CompilerParams(
            dimension_semantics=("parallel", "arbitrary"),
        ),
    )(s2, t2)

    # Tiny epilogue (N x N arrays): sum partial grams, then combine.
    g_ss = jnp.sum(out_ss, axis=0)
    g_tt = jnp.sum(out_tt, axis=0)
    g_st = jnp.sum(out_st, axis=0)

    c_s = jnp.float32(n_s - 1)          # n == 1 -> inf/nan, as in the reference
    c_t = jnp.float32(n_t - 1)
    fro = (jnp.sum(g_ss * g_ss) / (c_s * c_s)
           + jnp.sum(g_tt * g_tt) / (c_t * c_t)
           - 2.0 * jnp.sum(g_st * g_st) / (c_s * c_t))
    return fro / jnp.float32(4 * d_chan * d_chan)


def coral_loss_ref(source, target):
    """Pure-JAX reference (mirrors the PyTorch forward)."""
    d = source.shape[1]
    s = source.reshape(source.shape[0], -1).astype(jnp.float32)
    t = target.reshape(target.shape[0], -1).astype(jnp.float32)
    hp = lax.Precision.HIGHEST
    s_cov = jnp.dot(s.T, s, precision=hp) / (source.shape[0] - 1)
    t_cov = jnp.dot(t.T, t, precision=hp) / (target.shape[0] - 1)
    diff = s_cov - t_cov
    return jnp.sum(diff * diff) / (4 * d * d)


if __name__ == "__main__":
    key = jax.random.PRNGKey(0)
    k1, k2, k3, k4, k5, k6 = jax.random.split(key, 6)

    # 1) Small NCHW demo, single feature block: batch=2, C=4, 16x16 -> D=1024.
    src = jax.random.normal(k1, (2, 4, 16, 16), dtype=jnp.float32)
    tgt = jax.random.normal(k2, (2, 4, 16, 16), dtype=jnp.float32)
    out = jax.block_until_ready(coral_loss(src, tgt))
    ref = coral_loss_ref(src, tgt)
    assert jnp.allclose(out, ref, rtol=2e-2, atol=1e-6), (out, ref)

    # 2) Unequal batch sizes + tiled feature axis: D=512, tD=128 -> grid (2, 2).
    src2 = jax.random.normal(k3, (3, 8, 8, 8), dtype=jnp.float32)
    tgt2 = jax.random.normal(k4, (5, 8, 8, 8), dtype=jnp.float32)
    out2 = jax.block_until_ready(coral_loss(src2, tgt2, tile_d=128))
    ref2 = coral_loss_ref(src2, tgt2)
    assert jnp.allclose(out2, ref2, rtol=2e-2, atol=1e-6), (out2, ref2)

    # 3) Feature dim not a tile multiple (zero-pad path): D=400, tD=128.
    src3 = jax.random.normal(k5, (2, 4, 10, 10), dtype=jnp.float32)
    tgt3 = jax.random.normal(k6, (2, 4, 10, 10), dtype=jnp.float32)
    out3 = jax.block_until_ready(coral_loss(src3, tgt3, tile_d=128))
    ref3 = coral_loss_ref(src3, tgt3)
    assert jnp.allclose(out3, ref3, rtol=2e-2, atol=1e-6), (out3, ref3)

    print("KERNEL_OK")
</pallas_src>

<mosaic_0001>
module attributes {stable_mosaic.version = 11 : i64} {
  func.func @_coral_gram_kernel(%arg0: i32, %arg1: i32, %arg2: memref<2x1024xf32, #tpu.memory_space<vmem>>, %arg3: memref<2x1024xf32, #tpu.memory_space<vmem>>, %arg4: memref<1x2x2xf32, #tpu.memory_space<vmem>>, %arg5: memref<1x2x2xf32, #tpu.memory_space<vmem>>, %arg6: memref<1x2x2xf32, #tpu.memory_space<vmem>>) attributes {dimension_semantics = [#tpu.dimension_semantics<parallel>, #tpu.dimension_semantics<arbitrary>], iteration_bounds = array<i64: 1, 1>, scalar_prefetch = 0 : i64, scratch_operands = 0 : i64, tpu.core_type = #tpu.core_type<tc>, window_params = [{transform_indices = @transform_0, window_bounds = array<i64: 2, 1024>}, {transform_indices = @transform_1, window_bounds = array<i64: 2, 1024>}, {transform_indices = @transform_2, window_bounds = array<i64: 1, 2, 2>}, {transform_indices = @transform_3, window_bounds = array<i64: 1, 2, 2>}, {transform_indices = @transform_4, window_bounds = array<i64: 1, 2, 2>}]} {
    %c0_i32 = arith.constant 0 : i32
    %0 = arith.cmpi eq, %arg1, %c0_i32 : i32
    %1 = arith.extui %0 : i1 to i32
    %c0_i32_0 = arith.constant 0 : i32
    %2 = arith.cmpi ne, %1, %c0_i32_0 : i32
    scf.if %2 {
      %cst_24 = arith.constant 0.000000e+00 : f32
      %26 = vector.broadcast %cst_24 : f32 to vector<2x2xf32>
      %c0_25 = arith.constant 0 : index
      %c0_26 = arith.constant 0 : index
      %c0_27 = arith.constant 0 : index
      %27 = vector.load %arg4[%c0_25, %c0_26, %c0_27] : memref<1x2x2xf32, #tpu.memory_space<vmem>>, vector<1x2x2xf32>
      %28 = vector.shape_cast %27 : vector<1x2x2xf32> to vector<2x2xf32>
      %29 = vector.shape_cast %26 : vector<2x2xf32> to vector<1x2x2xf32>
      tpu.vector_store %arg4[%c0_25, %c0_26, %c0_27], %29 {strides = array<i32>} : memref<1x2x2xf32, #tpu.memory_space<vmem>>, vector<1x2x2xf32>,
      %cst_28 = arith.constant 0.000000e+00 : f32
      %30 = vector.broadcast %cst_28 : f32 to vector<2x2xf32>
      %c0_29 = arith.constant 0 : index
      %c0_30 = arith.constant 0 : index
      %c0_31 = arith.constant 0 : index
      %31 = vector.load %arg5[%c0_29, %c0_30, %c0_31] : memref<1x2x2xf32, #tpu.memory_space<vmem>>, vector<1x2x2xf32>
      %32 = vector.shape_cast %31 : vector<1x2x2xf32> to vector<2x2xf32>
      %33 = vector.shape_cast %30 : vector<2x2xf32> to vector<1x2x2xf32>
      tpu.vector_store %arg5[%c0_29, %c0_30, %c0_31], %33 {strides = array<i32>} : memref<1x2x2xf32, #tpu.memory_space<vmem>>, vector<1x2x2xf32>,
      %cst_32 = arith.constant 0.000000e+00 : f32
      %34 = vector.broadcast %cst_32 : f32 to vector<2x2xf32>
      %c0_33 = arith.constant 0 : index
      %c0_34 = arith.constant 0 : index
      %c0_35 = arith.constant 0 : index
      %35 = vector.load %arg6[%c0_33, %c0_34, %c0_35] : memref<1x2x2xf32, #tpu.memory_space<vmem>>, vector<1x2x2xf32>
      %36 = vector.shape_cast %35 : vector<1x2x2xf32> to vector<2x2xf32>
      %37 = vector.shape_cast %34 : vector<2x2xf32> to vector<1x2x2xf32>
      tpu.vector_store %arg6[%c0_33, %c0_34, %c0_35], %37 {strides = array<i32>} : memref<1x2x2xf32, #tpu.memory_space<vmem>>, vector<1x2x2xf32>,
    } else {
    }
    %c0 = arith.constant 0 : index
    %c0_1 = arith.constant 0 : index
    %3 = vector.load %arg2[%c0, %c0_1] : memref<2x1024xf32, #tpu.memory_space<vmem>>, vector<2x1024xf32>
    %c0_2 = arith.constant 0 : index
    %c0_3 = arith.constant 0 : index
    %4 = vector.load %arg3[%c0_2, %c0_3] : memref<2x1024xf32, #tpu.memory_space<vmem>>, vector<2x1024xf32>
    %c0_4 = arith.constant 0 : index
    %c0_5 = arith.constant 0 : index
    %c0_6 = arith.constant 0 : index
    %5 = vector.load %arg4[%c0_4, %c0_5, %c0_6] : memref<1x2x2xf32, #tpu.memory_space<vmem>>, vector<1x2x2xf32>
    %6 = vector.shape_cast %5 : vector<1x2x2xf32> to vector<2x2xf32>
    %cst = arith.constant dense<0.000000e+00> : vector<2x2xf32>
    %7 = tpu.matmul %3, %3, %cst {dimension_numbers = #tpu.dot_dimension_numbers<[1], [1], [0], [0], [0, 0, 1, 0], [], []>, precision = #tpu.contract_precision<fp32>} : vector<2x1024xf32>, vector<2x1024xf32>, vector<2x2xf32> -> vector<2x2xf32>
    %8 = arith.addf %6, %7 : vector<2x2xf32>
    %c0_7 = arith.constant 0 : index
    %c0_8 = arith.constant 0 : index
    %c0_9 = arith.constant 0 : index
    %9 = vector.load %arg4[%c0_7, %c0_8, %c0_9] : memref<1x2x2xf32, #tpu.memory_space<vmem>>, vector<1x2x2xf32>
    %10 = vector.shape_cast %9 : vector<1x2x2xf32> to vector<2x2xf32>
    %11 = vector.shape_cast %8 : vector<2x2xf32> to vector<1x2x2xf32>
    tpu.vector_store %arg4[%c0_7, %c0_8, %c0_9], %11 {strides = array<i32>} : memref<1x2x2xf32, #tpu.memory_space<vmem>>, vector<1x2x2xf32>,
    %c0_10 = arith.constant 0 : index
    %c0_11 = arith.constant 0 : index
    %c0_12 = arith.constant 0 : index
    %12 = vector.load %arg5[%c0_10, %c0_11, %c0_12] : memref<1x2x2xf32, #tpu.memory_space<vmem>>, vector<1x2x2xf32>
    %13 = vector.shape_cast %12 : vector<1x2x2xf32> to vector<2x2xf32>
    %cst_13 = arith.constant dense<0.000000e+00> : vector<2x2xf32>
    %14 = tpu.matmul %4, %4, %cst_13 {dimension_numbers = #tpu.dot_dimension_numbers<[1], [1], [0], [0], [0, 0, 1, 0], [], []>, precision = #tpu.contract_precision<fp32>} : vector<2x1024xf32>, vector<2x1024xf32>, vector<2x2xf32> -> vector<2x2xf32>
    %15 = arith.addf %13, %14 : vector<2x2xf32>
    %c0_14 = arith.constant 0 : index
    %c0_15 = arith.constant 0 : index
    %c0_16 = arith.constant 0 : index
    %16 = vector.load %arg5[%c0_14, %c0_15, %c0_16] : memref<1x2x2xf32, #tpu.memory_space<vmem>>, vector<1x2x2xf32>
    %17 = vector.shape_cast %16 : vector<1x2x2xf32> to vector<2x2xf32>
    %18 = vector.shape_cast %15 : vector<2x2xf32> to vector<1x2x2xf32>
    tpu.vector_store %arg5[%c0_14, %c0_15, %c0_16], %18 {strides = array<i32>} : memref<1x2x2xf32, #tpu.memory_space<vmem>>, vector<1x2x2xf32>,
    %c0_17 = arith.constant 0 : index
    %c0_18 = arith.constant 0 : index
    %c0_19 = arith.constant 0 : index
    %19 = vector.load %arg6[%c0_17, %c0_18, %c0_19] : memref<1x2x2xf32, #tpu.memory_space<vmem>>, vector<1x2x2xf32>
    %20 = vector.shape_cast %19 : vector<1x2x2xf32> to vector<2x2xf32>
    %cst_20 = arith.constant dense<0.000000e+00> : vector<2x2xf32>
    %21 = tpu.matmul %3, %4, %cst_20 {dimension_numbers = #tpu.dot_dimension_numbers<[1], [1], [0], [0], [0, 0, 1, 0], [], []>, precision = #tpu.contract_precision<fp32>} : vector<2x1024xf32>, vector<2x1024xf32>, vector<2x2xf32> -> vector<2x2xf32>
    %22 = arith.addf %20, %21 : vector<2x2xf32>
    %c0_21 = arith.constant 0 : index
    %c0_22 = arith.constant 0 : index
    %c0_23 = arith.constant 0 : index
    %23 = vector.load %arg6[%c0_21, %c0_22, %c0_23] : memref<1x2x2xf32, #tpu.memory_space<vmem>>, vector<1x2x2xf32>
    %24 = vector.shape_cast %23 : vector<1x2x2xf32> to vector<2x2xf32>
    %25 = vector.shape_cast %22 : vector<2x2xf32> to vector<1x2x2xf32>
    tpu.vector_store %arg6[%c0_21, %c0_22, %c0_23], %25 {strides = array<i32>} : memref<1x2x2xf32, #tpu.memory_space<vmem>>, vector<1x2x2xf32>,
    return
  }
  func.func @transform_0(%arg0: i32, %arg1: i32) -> (i32, i32) {
    %c1_i32 = arith.constant 1 : i32
    %0 = arith.muli %arg0, %c1_i32 : i32
    %1 = arith.addi %0, %arg1 : i32
    %c0_i32 = arith.constant 0 : i32
    %c0_i32_0 = arith.constant 0 : i32
    return %c0_i32, %1 : i32, i32
  }
  func.func @transform_1(%arg0: i32, %arg1: i32) -> (i32, i32) {
    %c1_i32 = arith.constant 1 : i32
    %0 = arith.muli %arg0, %c1_i32 : i32
    %1 = arith.addi %0, %arg1 : i32
    %c0_i32 = arith.constant 0 : i32
    %c0_i32_0 = arith.constant 0 : i32
    return %c0_i32, %1 : i32, i32
  }
  func.func @transform_2(%arg0: i32, %arg1: i32) -> (i32, i32, i32) {
    %c0_i32 = arith.constant 0 : i32
    %c0_i32_0 = arith.constant 0 : i32
    %c0_i32_1 = arith.constant 0 : i32
    return %arg0, %c0_i32, %c0_i32_0 : i32, i32, i32
  }
  func.func @transform_3(%arg0: i32, %arg1: i32) -> (i32, i32, i32) {
    %c0_i32 = arith.constant 0 : i32
    %c0_i32_0 = arith.constant 0 : i32
    %c0_i32_1 = arith.constant 0 : i32
    return %arg0, %c0_i32, %c0_i32_0 : i32, i32, i32
  }
  func.func @transform_4(%arg0: i32, %arg1: i32) -> (i32, i32, i32) {
    %c0_i32 = arith.constant 0 : i32
    %c0_i32_0 = arith.constant 0 : i32
    %c0_i32_1 = arith.constant 0 : i32
    return %arg0, %c0_i32, %c0_i32_0 : i32, i32, i32
  }
}

</mosaic_0001>

<bundles_post_ra>
// kernel: tpu_custom_call.1
= control target key start
LH: loop header
LB: loop body
LE: loop exit
PB: predicated region body
PF: predicated region fallthrough
CT: control target
= control target key end

     0   :  { %10 = vsyncpa [#allocation3], 0  ;;  %s6586_s0 = inlined_call_operand.hbm [shape: f32[2,1024], index: 0, kind: input, shape index: {}]   ;;  %s6587_s1 = inlined_call_operand.hbm [shape: f32[2,1024], index: 1, kind: input, shape index: {}]   ;;  %s6588_s2 = inlined_call_operand.hbm [shape: f32[1,2,2], index: 2, kind: output, shape index: {0}]   ;;  %s6589_s3 = inlined_call_operand.hbm [shape: f32[1,2,2], index: 3, kind: output, shape index: {1}]   ;;  %s6590_s4 = inlined_call_operand.hbm [shape: f32[1,2,2], index: 4, kind: output, shape index: {2}]  }
   0x1   :  { %11 = vsyncpa [#allocation6], 0 }
   0x2   :  { %12 = vsyncpa [#allocation4], 0 }
   0x3   :  { %13 = vsyncpa [#allocation9], 0  ;;  %s5998_s15 = smov [#allocation2]   ;;  %s5999_s17 = smov [#allocation5]  }
   0x4   :  { %s24_s16 = sshll.u32 %s5998_s15, 4  ;;  %s38_s18 = sshll.u32 %s5999_s17, 4  ;;  %s25_s16 = int_to_ptr.vmem [resolvable:$true] %s24_s16  ;;  %s39_s18 = int_to_ptr.vmem [resolvable:$true] %s38_s18 }
   0x5   :  { %s5880_s21 = scalar_lea.hbm %s6586_s0, 256 }
   0x6   :  { %p5881_p0 = scmp.ne.s32.totalorder %s6586_s0, %s5880_s21  ;;  %p5884_p1 = scmp.lt.u32.totalorder %s5880_s21, %s6586_s0 }
   0x8   :  { %p5886_p2 = pnand %p5884_p1, %p5881_p0 }
   0xa   :  { %5889 = shalt.err (!%p5886_p2)
}
   0xb   :  { %s5890_s26 = scalar_lea.vmem %s25_s16, 256  ;;  %p5895_p4 = scmp.lt.s32.totalorder %s25_s16, %s25_s16 }
   0xc   :  { %p5891_p3 = scmp.ne.s32.totalorder %s25_s16, %s5890_s26  ;;  %p5896_p5 = scmp.lt.s32.totalorder %s5890_s26, %s5890_s26 }
   0xe   :  { %p5897_p6 = por %p5896_p5, %p5895_p4 }
  0x10   :  { %p5898_p7 = pnand %p5897_p6, %p5891_p3 }
  0x12   :  { %5901 = shalt.err (!%p5898_p7)
}
  0x13   :  { %27 = dma.hbm_to_vmem [thread:$0]  %s6586_s0, 256, %s25_s16, [#allocation3]  }
  0x14   :  { %s5902_s5 = scalar_lea.hbm %s6587_s1, 256 }
  0x15   :  { %p5903_p8 = scmp.ne.s32.totalorder %s6587_s1, %s5902_s5  ;;  %p5906_p9 = scmp.lt.u32.totalorder %s5902_s5, %s6587_s1 }
  0x17   :  { %p5908_p10 = pnand %p5906_p9, %p5903_p8 }
  0x19   :  { %5911 = shalt.err (!%p5908_p10)
}
  0x1a   :  { %s5912_s10 = scalar_lea.vmem %s39_s18, 256  ;;  %p5917_p12 = scmp.lt.s32.totalorder %s39_s18, %s39_s18 }
  0x1b   :  { %p5913_p11 = scmp.ne.s32.totalorder %s39_s18, %s5912_s10  ;;  %p5918_p13 = scmp.lt.s32.totalorder %s5912_s10, %s5912_s10 }
  0x1d   :  { %p5919_p0 = por %p5918_p13, %p5917_p12 }
  0x1f   :  { %p5920_p1 = pnand %p5919_p0, %p5913_p11 }
  0x21   :  { %5923 = shalt.err (!%p5920_p1)
}
  0x22   :  { %41 = dma.hbm_to_vmem [thread:$0]  %s6587_s1, 256, %s39_s18, [#allocation6]  }
  0x23   :  { %5990 = dma.done.wait [#allocation3], 256  }
  0x24   :  { %5991 = vsyncadd [#allocation3], 4294967040 }
  0x25   :  { %5992 = dma.done.wait [#allocation6], 256  }
  0x26   :  { %5993 = vsyncadd [#allocation6], 4294967040  ;;  %v71_v0 = vlaneseq  ;;  %v6000_v1 = vmov 1983009808   ;;  %v60_v6 = vld [vmem:[#allocation2] sm:$0xff]  ;;  %v61_v18 = vld [vmem:[#allocation2 + $0x8] sm:$0xff] }
  0x27   :  { %v69_v2 = vunpack.c.l.s4 %v6000_v1  ;;  %v67_v8 = vcombine.high %v60_v6, %v60_v6  ;;  %v84_v33 = vcombine.high %v61_v18, %v61_v18  ;;  %v62_v46 = vld [vmem:[#allocation5] sm:$0xff]  ;;  %vm56_vm0 = vcmask 9216   ;;  %s6002_s1 = smov [#allocation7]  }
  0x28   :  { %v72_v3 = vshrl.u32 %v71_v0, 7  ;;  %v2003_v59 = vcombine.high %v62_v46, %v62_v46  ;;  %s5832_s12 = sshll.u32 %s6002_s1, 4  ;;  %s5833_s12 = int_to_ptr.vmem [resolvable:$true] %s5832_s12 }
  0x29   :  { %v70_v4 = vunpack.c.0.s8 %v69_v2  ;;  %s5924_s13 = scalar_lea.vmem %s5833_s12, 32  ;;  %p5929_p3 = scmp.lt.s32.totalorder %s5833_s12, %s5833_s12 }
  0x2a   :  { %p5925_p2 = scmp.ne.s32.totalorder %s5833_s12, %s5924_s13  ;;  %p5930_p4 = scmp.lt.s32.totalorder %s5924_s13, %s5924_s13 }
  0x2b   :  { %v6054_v5 = vsub.s32 %v70_v4, %v72_v3 }
  0x2c   :  { %p5931_p5 = por %p5930_p4, %p5929_p3 }
  0x2d   :  { %v74_v7 = vrot.slane %v60_v6, %v6054_v5  ;;  %v81_v11 = vrot.slane %v67_v8, %v6054_v5  ;;  %v91_v23 = vrot.slane %v61_v18, %v6054_v5  ;;  %v98_v38 = vrot.slane %v84_v33, %v6054_v5 }
  0x2e   :  { %v2010_v51 = vrot.slane %v62_v46, %v6054_v5  ;;  %v2017_v0 = vrot.slane %v2003_v59, %v6054_v5  ;;  %p5932_p6 = pnand %p5931_p5, %p5925_p2 }
  0x2f   :  { %v82_v9 = vcombine.high %v74_v7, %v74_v7  ;;  %v6057_v10 = vand.u32 4294901760, %v74_v7  ;;  %v83_v14 = vcombine.high %v81_v11, %v81_v11  ;;  %v6076_v19 = vand.u32 4294901760, %v81_v11 }
  0x30   :  { %v99_v29 = vcombine.high %v91_v23, %v91_v23  ;;  %v6120_v35 = vand.u32 4294901760, %v91_v23  ;;  %v100_v42 = vcombine.high %v98_v38, %v98_v38  ;;  %v6169_v48 = vand.u32 4294901760, %v98_v38 }
  0x31   :  { %v6060_v12 = vand.u32 4294901760, %v82_v9  ;;  %v6063_v13 = vsub.f32 %v74_v7, %v6057_v10  ;;  %v6073_v17 = vand.u32 4294901760, %v83_v14  ;;  %v6093_v26 = vsub.f32 %v81_v11, %v6076_v19 }
  0x32   :  { %v6113_v32 = vand.u32 4294901760, %v99_v29  ;;  %v6139_v40 = vsub.f32 %v91_v23, %v6120_v35  ;;  %v6161_v45 = vand.u32 4294901760, %v100_v42  ;;  %v6188_v53 = vsub.f32 %v98_v38, %v6169_v48 }
  0x33   :  { %110 = vmatprep.subr.mxu0 %v6060_v12  ;;  %v6067_v15 = vsub.f32 %v82_v9, %v6060_v12  ;;  %v6070_v16 = vand.u32 4294901760, %v6063_v13  ;;  %266 = vmatprep.mubr.f32.mxu1 %v6060_v12  ;;  %v6085_v22 = vsub.f32 %v83_v14, %v6073_v17  ;;  %v6105_v30 = vand.u32 4294901760, %v6093_v26  ;;  %v63_v9 = vld [vmem:[#allocation5 + $0x8] sm:$0xff] }
  0x34   :  { %112 = vmatpush1.xpose.msra.mxu0 %v6057_v10  ;;  %v6129_v37 = vsub.f32 %v99_v29, %v6113_v32  ;;  %v6153_v43 = vand.u32 4294901760, %v6139_v40  ;;  %v6178_v50 = vsub.f32 %v100_v42, %v6161_v45  ;;  %v2018_v55 = vcombine.high %v2010_v51, %v2010_v51 }
  0x35   :  { %v6079_v20 = vand.u32 4294901760, %v6067_v15  ;;  %v184_v21 = vsub.f32 %v6063_v13, %v6070_v16  ;;  %275 = vmatprep.subr.mxu0 %v6067_v15  ;;  %v6098_v28 = vand.u32 4294901760, %v6085_v22  ;;  %v656_v34 = vsub.f32 %v6093_v26, %v6105_v30 }
  0x36   :  { %v6146_v41 = vand.u32 4294901760, %v6129_v37  ;;  %v1128_v47 = vsub.f32 %v6139_v40, %v6153_v43  ;;  %v6195_v54 = vand.u32 4294901760, %v6178_v50  ;;  %v6202_v56 = vand.u32 4294901760, %v6188_v53 }
  0x37   :  { %v178_v24 = vsub.f32 %v6067_v15, %v6079_v20  ;;  %v6090_v25 = vand.u32 4294901760, %v184_v21  ;;  %v650_v31 = vsub.f32 %v6085_v22, %v6098_v28  ;;  %v6136_v39 = vand.u32 4294901760, %v656_v34 }
  0x38   :  { %v1122_v44 = vsub.f32 %v6129_v37, %v6146_v41  ;;  %v6185_v52 = vand.u32 4294901760, %v1128_v47  ;;  %6593 = vst [vmem:[#allocation15_spill] sm:$0xff] %v6195_v54  ;;  %6594 = vst [vmem:[#allocation16_spill] sm:$0xff] %v6202_v56  ;;  %v1594_v57 = vsub.f32 %v6178_v50, %v6195_v54  ;;  %v6210_v58 = vand.u32 4294901760, %v2018_v55 }
  0x39   :  { %v6095_v27 = vand.u32 4294901760, %v178_v24  ;;  %v6126_v36 = vand.u32 4294901760, %v650_v31  ;;  %v1600_v60 = vsub.f32 %v6188_v53, %v6202_v56  ;;  %v6218_v61 = vand.u32 4294901760, %v2010_v51 }
  0x3a   :  { %v6175_v49 = vand.u32 4294901760, %v1122_v44  ;;  %v6224_v62 = vand.u32 4294901760, %v1594_v57  ;;  %v6227_v63 = vsub.f32 %v2018_v55, %v6210_v58  ;;  %v2019_v4 = vcombine.high %v2017_v0, %v2017_v0 }
  0x3b   :  { %196 = vmatprep.subr.mxu1 %v6095_v27  ;;  %180 = vmatprep.mubr.f32.mxu0 %v6095_v27  ;;  %v6234_v1 = vand.u32 4294901760, %v1600_v60  ;;  %v6237_v2 = vsub.f32 %v2010_v51, %v6218_v61  ;;  %v6267_v14 = vand.u32 4294901760, %v2017_v0  ;;  %v2027_v23 = vrot.slane %v63_v9, %v6054_v5 }
  0x3c   :  { %202 = vmatpush1.xpose.msra.mxu1 %v6090_v25  ;;  %186 = vmatmul.mubr.f32.vlgmr.msra.gmra.mrb[0].mxu0 %v6090_v25  ;;  %v6244_v3 = vand.u32 4294901760, %v6227_v63  ;;  %v6259_v8 = vand.u32 4294901760, %v2019_v4  ;;  %v2020_v44 = vcombine.high %v63_v9, %v63_v9 }
  0x3d   :  { %278 = vmatpush1.xpose.msra.mxu0 %v6063_v13  ;;  %352 = vmatprep.subr.mxu1 %v6060_v12  ;;  %v6251_v6 = vand.u32 4294901760, %v6237_v2  ;;  %v6286_v29 = vsub.f32 %v2017_v0, %v6267_v14  ;;  %v2035_v33 = vcombine.high %v2027_v23, %v2027_v23  ;;  %v6316_v47 = vand.u32 4294901760, %v2027_v23 }
  0x3e   :  { %343 = vmatprep.mubr.f32.mxu0 %v6067_v15  ;;  %432 = vmatprep.subr.mxu0 %v6079_v20  ;;  %v2114_v7 = vsub.f32 %v6227_v63, %v6244_v3  ;;  %v6276_v21 = vsub.f32 %v2019_v4, %v6259_v8  ;;  %v2034_v57 = vrot.slane %v2020_v44, %v6054_v5 }
  0x3f   :  { %268 = vmatmul.mubr.f32.vlgmr.msra.gmra.mrb[0].mxu1 %v6057_v10  ;;  %v2120_v11 = vsub.f32 %v6237_v2, %v6251_v6  ;;  %v6300_v34 = vand.u32 4294901760, %v6286_v29  ;;  %v6308_v42 = vand.u32 4294901760, %v2035_v33  ;;  %v6335_v60 = vsub.f32 %v2027_v23, %v6316_v47 }
  0x40   :  { %354 = vmatpush1.xpose.msra.mxu1 %v6057_v10  ;;  %346 = vmatmul.mubr.f32.vlgmr.msra.gmra.mrb[2].mxu0 %v6063_v13  ;;  %v6273_v18 = vand.u32 4294901760, %v2114_v7  ;;  %v6293_v31 = vand.u32 4294901760, %v6276_v21  ;;  %v2036_v0 = vcombine.high %v2034_v57, %v2034_v57  ;;  %v6365_v23 = vand.u32 4294901760, %v2034_v57 }
  0x41   :  { %420 = vmatprep.mubr.f32.mxu1 %v6079_v20  ;;  %436 = vmatpush1.xpose.msra.mxu0 %v6070_v16  ;;  %v6283_v24 = vand.u32 4294901760, %v2120_v11  ;;  %v2592_v46 = vsub.f32 %v6286_v29, %v6300_v34  ;;  %v6325_v55 = vsub.f32 %v2035_v33, %v6308_v42  ;;  %v6349_v4 = vand.u32 4294901760, %v6335_v60 }
  0x42   :  { %508 = vmatprep.subr.mxu1 %v6060_v12  ;;  %500 = vmatprep.mubr.f32.mxu0 %v6060_v12  ;;  %v2586_v38 = vsub.f32 %v6276_v21, %v6293_v31  ;;  %v6357_v9 = vand.u32 4294901760, %v2036_v0 }
  0x43   :  { %424 = vmatmul.mubr.f32.vlgmr.msra.gmra.mrb[2].mxu1 %v6070_v16  ;;  %582 = vmatprep.subr.mxu0 %v6073_v17  ;;  %v6332_v59 = vand.u32 4294901760, %v2592_v46  ;;  %v6342_v5 = vand.u32 4294901760, %v6325_v55  ;;  %v3064_v11 = vsub.f32 %v6335_v60, %v6349_v4  ;;  %v6383_v46 = vsub.f32 %v2034_v57, %v6365_v23 }
  0x44   :  { %510 = vmatpush1.xpose.msra.mxu1 %v6057_v10  ;;  %502 = vmatmul.mubr.f32.vlgmr.msra.gmra.mrb[4].mxu0 %v6057_v10  ;;  %v6322_v51 = vand.u32 4294901760, %v2586_v38  ;;  %v6374_v38 = vsub.f32 %v2036_v0, %v6357_v9 }
  0x45   :  { %574 = vmatprep.mubr.f32.mxu1 %v6060_v12  ;;  %584 = vmatpush1.xpose.msra.mxu0 %v6076_v19  ;;  %v3058_v7 = vsub.f32 %v6325_v55, %v6342_v5  ;;  %v6380_v44 = vand.u32 4294901760, %v3064_v11  ;;  %v6397_v57 = vand.u32 4294901760, %v6383_v46 }
  0x46   :  { %668 = vmatprep.subr.mxu1 %v6126_v36  ;;  %652 = vmatprep.mubr.f32.mxu0 %v6126_v36  ;;  %v6390_v0 = vand.u32 4294901760, %v6374_v38 }
  0x47   :  { %576 = vmatmul.mubr.f32.vlgmr.msra.gmra.mrb[4].mxu1 %v6057_v10  ;;  %747 = vmatprep.subr.mxu0 %v6085_v22  ;;  %v6371_v33 = vand.u32 4294901760, %v3058_v7  ;;  %v3536_v11 = vsub.f32 %v6383_v46, %v6397_v57 }
  0x48   :  { %674 = vmatpush1.xpose.msra.mxu1 %v6136_v39  ;;  %658 = vmatmul.mubr.f32.vlgmr.msra.gmra.mrb[6].mxu0 %v6136_v39  ;;  %v3530_v7 = vsub.f32 %v6374_v38, %v6390_v0 }
  0x49   :  { %738 = vmatprep.mubr.f32.mxu1 %v6073_v17  ;;  %750 = vmatpush1.xpose.msra.mxu0 %v6093_v26 }
  0x4a   :  { %824 = vmatprep.subr.mxu1 %v6073_v17  ;;  %815 = vmatprep.mubr.f32.mxu0 %v6085_v22 }
  0x4b   :  { %740 = vmatmul.mubr.f32.vlgmr.msra.gmra.mrb[6].mxu1 %v6076_v19  ;;  %904 = vmatprep.subr.mxu0 %v6098_v28 }
  0x4c   :  { %826 = vmatpush1.xpose.msra.mxu1 %v6076_v19  ;;  %818 = vmatmul.mubr.f32.vlgmr.msra.gmra.mrb[8].mxu0 %v6093_v26 }
  0x4d   :  { %892 = vmatprep.mubr.f32.mxu1 %v6098_v28  ;;  %908 = vmatpush1.xpose.msra.mxu0 %v6105_v30 }
  0x4e   :  { %980 = vmatprep.subr.mxu1 %v6073_v17  ;;  %972 = vmatprep.mubr.f32.mxu0 %v6073_v17 }
  0x4f   :  { %896 = vmatmul.mubr.f32.vlgmr.msra.gmra.mrb[8].mxu1 %v6105_v30  ;;  %1054 = vmatprep.subr.mxu0 %v6113_v32 }
  0x50   :  { %982 = vmatpush1.xpose.msra.mxu1 %v6076_v19  ;;  %974 = vmatmul.mubr.f32.vlgmr.msra.gmra.mrb[10].mxu0 %v6076_v19 }
  0x51   :  { %1046 = vmatprep.mubr.f32.mxu1 %v6073_v17  ;;  %1056 = vmatpush1.xpose.msra.mxu0 %v6120_v35 }
  0x52   :  { %1140 = vmatprep.subr.mxu1 %v6175_v49  ;;  %1124 = vmatprep.mubr.f32.mxu0 %v6175_v49 }
  0x53   :  { %1048 = vmatmul.mubr.f32.vlgmr.msra.gmra.mrb[10].mxu1 %v6076_v19  ;;  %1219 = vmatprep.subr.mxu0 %v6129_v37 }
  0x54   :  { %1146 = vmatpush1.xpose.msra.mxu1 %v6185_v52  ;;  %1130 = vmatmul.mubr.f32.vlgmr.msra.gmra.mrb[12].mxu0 %v6185_v52 }
  0x55   :  { %1210 = vmatprep.mubr.f32.mxu1 %v6113_v32  ;;  %1222 = vmatpush1.xpose.msra.mxu0 %v6139_v40 }
  0x56   :  { %1296 = vmatprep.subr.mxu1 %v6113_v32  ;;  %1287 = vmatprep.mubr.f32.mxu0 %v6129_v37 }
  0x57   :  { %1212 = vmatmul.mubr.f32.vlgmr.msra.gmra.mrb[12].mxu1 %v6120_v35  ;;  %1376 = vmatprep.subr.mxu0 %v6146_v41 }
  0x58   :  { %1298 = vmatpush1.xpose.msra.mxu1 %v6120_v35  ;;  %1290 = vmatmul.mubr.f32.vlgmr.msra.gmra.mrb[14].mxu0 %v6139_v40 }
  0x59   :  { %1364 = vmatprep.mubr.f32.mxu1 %v6146_v41  ;;  %1380 = vmatpush1.xpose.msra.mxu0 %v6153_v43 }
  0x5a   :  { %1452 = vmatprep.subr.mxu1 %v6113_v32  ;;  %1444 = vmatprep.mubr.f32.mxu0 %v6113_v32 }
  0x5b   :  { %1368 = vmatmul.mubr.f32.vlgmr.msra.gmra.mrb[14].mxu1 %v6153_v43  ;;  %1526 = vmatprep.subr.mxu0 %v6161_v45 }
  0x5c   :  { %1454 = vmatpush1.xpose.msra.mxu1 %v6120_v35  ;;  %1446 = vmatmul.mubr.f32.vlgmr.msra.gmra.mrb[16].mxu0 %v6120_v35 }
  0x5d   :  { %1518 = vmatprep.mubr.f32.mxu1 %v6113_v32  ;;  %1528 = vmatpush1.xpose.msra.mxu0 %v6169_v48 }
  0x5e   :  { %1612 = vmatprep.subr.mxu1 %v6224_v62  ;;  %1596 = vmatprep.mubr.f32.mxu0 %v6224_v62 }
  0x5f   :  { %1520 = vmatmul.mubr.f32.vlgmr.msra.gmra.mrb[16].mxu1 %v6120_v35  ;;  %1691 = vmatprep.subr.mxu0 %v6178_v50 }
  0x60   :  { %1618 = vmatpush1.xpose.msra.mxu1 %v6234_v1  ;;  %1602 = vmatmul.mubr.f32.vlgmr.msra.gmra.mrb[18].mxu0 %v6234_v1 }
  0x61   :  { %1682 = vmatprep.mubr.f32.mxu1 %v6161_v45  ;;  %1694 = vmatpush1.xpose.msra.mxu0 %v6188_v53 }
  0x62   :  { %1768 = vmatprep.subr.mxu1 %v6161_v45  ;;  %1759 = vmatprep.mubr.f32.mxu0 %v6178_v50 }
  0x63   :  { %1684 = vmatmul.mubr.f32.vlgmr.msra.gmra.mrb[18].mxu1 %v6169_v48  ;;  %1848 = vmatprep.subr.mxu0 %v6195_v54 }
  0x64   :  { %1770 = vmatpush1.xpose.msra.mxu1 %v6169_v48  ;;  %1762 = vmatmul.mubr.f32.vlgmr.msra.gmra.mrb[20].mxu0 %v6188_v53 }
  0x65   :  { %1836 = vmatprep.mubr.f32.mxu1 %v6195_v54  ;;  %1852 = vmatpush1.xpose.msra.mxu0 %v6202_v56  ;;  %v6421_v54 = vand.u32 4294901760, %v3536_v11 }
  0x66   :  { %1924 = vmatprep.subr.mxu1 %v6161_v45  ;;  %1916 = vmatprep.mubr.f32.mxu0 %v6161_v45 }
  0x67   :  { %1840 = vmatmul.mubr.f32.vlgmr.msra.gmra.mrb[20].mxu1 %v6202_v56  ;;  %2046 = vmatprep.subr.mxu0 %v6210_v58  ;;  %v6415_v56 = vand.u32 4294901760, %v3530_v7 }
  0x68   :  { %1926 = vmatpush1.xpose.msra.mxu1 %v6169_v48  ;;  %1918 = vmatmul.mubr.f32.vlgmr.msra.gmra.mrb[22].mxu0 %v6169_v48 }
  0x69   :  { %1990 = vmatprep.mubr.f32.mxu1 %v6161_v45  ;;  %2048 = vmatpush1.xpose.msra.mxu0 %v6218_v61 }
  0x6a   :  { %2132 = vmatprep.subr.mxu1 %v6273_v18  ;;  %2116 = vmatprep.mubr.f32.mxu0 %v6273_v18 }
  0x6b   :  { %1992 = vmatmul.mubr.f32.vlgmr.msra.gmra.mrb[22].mxu1 %v6169_v48  ;;  %2211 = vmatprep.subr.mxu0 %v6227_v63 }
  0x6c   :  { %2138 = vmatpush1.xpose.msra.mxu1 %v6283_v24  ;;  %2122 = vmatmul.mubr.f32.vlgmr.msra.gmra.mrb[24].mxu0 %v6283_v24 }
  0x6d   :  { %2202 = vmatprep.mubr.f32.mxu1 %v6210_v58  ;;  %2214 = vmatpush1.xpose.msra.mxu0 %v6237_v2 }
  0x6e   :  { %2288 = vmatprep.subr.mxu1 %v6210_v58  ;;  %2279 = vmatprep.mubr.f32.mxu0 %v6227_v63 }
  0x6f   :  { %2204 = vmatmul.mubr.f32.vlgmr.msra.gmra.mrb[24].mxu1 %v6218_v61  ;;  %2368 = vmatprep.subr.mxu0 %v6244_v3 }
  0x70   :  { %2290 = vmatpush1.xpose.msra.mxu1 %v6218_v61  ;;  %2282 = vmatmul.mubr.f32.vlgmr.msra.gmra.mrb[26].mxu0 %v6237_v2 }
  0x71   :  { %2356 = vmatprep.mubr.f32.mxu1 %v6244_v3  ;;  %2372 = vmatpush1.xpose.msra.mxu0 %v6251_v6 }
  0x72   :  { %2444 = vmatprep.subr.mxu1 %v6210_v58  ;;  %2436 = vmatprep.mubr.f32.mxu0 %v6210_v58 }
  0x73   :  { %2360 = vmatmul.mubr.f32.vlgmr.msra.gmra.mrb[26].mxu1 %v6251_v6  ;;  %2518 = vmatprep.subr.mxu0 %v6259_v8 }
  0x74   :  { %2446 = vmatpush1.xpose.msra.mxu1 %v6218_v61  ;;  %2438 = vmatmul.mubr.f32.vlgmr.msra.gmra.mrb[28].mxu0 %v6218_v61 }
  0x75   :  { %2510 = vmatprep.mubr.f32.mxu1 %v6210_v58  ;;  %2520 = vmatpush1.xpose.msra.mxu0 %v6267_v14 }
  0x76   :  { %2604 = vmatprep.subr.mxu1 %v6322_v51  ;;  %2588 = vmatprep.mubr.f32.mxu0 %v6322_v51 }
  0x77   :  { %2512 = vmatmul.mubr.f32.vlgmr.msra.gmra.mrb[28].mxu1 %v6218_v61  ;;  %2683 = vmatprep.subr.mxu0 %v6276_v21 }
  0x78   :  { %2610 = vmatpush1.xpose.msra.mxu1 %v6332_v59  ;;  %2594 = vmatmul.mubr.f32.vlgmr.msra.gmra.mrb[30].mxu0 %v6332_v59 }
  0x79   :  { %2674 = vmatprep.mubr.f32.mxu1 %v6259_v8  ;;  %2686 = vmatpush1.xpose.msra.mxu0 %v6286_v29 }
  0x7a   :  { %2760 = vmatprep.subr.mxu1 %v6259_v8  ;;  %2751 = vmatprep.mubr.f32.mxu0 %v6276_v21 }
  0x7b   :  { %2676 = vmatmul.mubr.f32.vlgmr.msra.gmra.mrb[30].mxu1 %v6267_v14  ;;  %2840 = vmatprep.subr.mxu0 %v6293_v31 }
  0x7c   :  { %2762 = vmatpush1.xpose.msra.mxu1 %v6267_v14  ;;  %2754 = vmatmul.mubr.f32.vlgmr.msra.gmra.mrb[32].mxu0 %v6286_v29 }
  0x7d   :  { %2828 = vmatprep.mubr.f32.mxu1 %v6293_v31  ;;  %2844 = vmatpush1.xpose.msra.mxu0 %v6300_v34 }
  0x7e   :  { %2916 = vmatprep.subr.mxu1 %v6259_v8  ;;  %2908 = vmatprep.mubr.f32.mxu0 %v6259_v8 }
  0x7f   :  { %2832 = vmatmul.mubr.f32.vlgmr.msra.gmra.mrb[32].mxu1 %v6300_v34  ;;  %2990 = vmatprep.subr.mxu0 %v6308_v42 }
  0x80   :  { %2918 = vmatpush1.xpose.msra.mxu1 %v6267_v14  ;;  %2910 = vmatmul.mubr.f32.vlgmr.msra.gmra.mrb[34].mxu0 %v6267_v14 }
  0x81   :  { %2982 = vmatprep.mubr.f32.mxu1 %v6259_v8  ;;  %2992 = vmatpush1.xpose.msra.mxu0 %v6316_v47 }
  0x82   :  { %3076 = vmatprep.subr.mxu1 %v6371_v33  ;;  %3060 = vmatprep.mubr.f32.mxu0 %v6371_v33 }
  0x83   :  { %2984 = vmatmul.mubr.f32.vlgmr.msra.gmra.mrb[34].mxu1 %v6267_v14  ;;  %3155 = vmatprep.subr.mxu0 %v6325_v55 }
  0x84   :  { %3082 = vmatpush1.xpose.msra.mxu1 %v6380_v44  ;;  %3066 = vmatmul.mubr.f32.vlgmr.msra.gmra.mrb[36].mxu0 %v6380_v44 }
  0x85   :  { %3146 = vmatprep.mubr.f32.mxu1 %v6308_v42  ;;  %3158 = vmatpush1.xpose.msra.mxu0 %v6335_v60 }
  0x86   :  { %3232 = vmatprep.subr.mxu1 %v6308_v42  ;;  %3223 = vmatprep.mubr.f32.mxu0 %v6325_v55 }
  0x87   :  { %3148 = vmatmul.mubr.f32.vlgmr.msra.gmra.mrb[36].mxu1 %v6316_v47  ;;  %3312 = vmatprep.subr.mxu0 %v6342_v5 }
  0x88   :  { %3234 = vmatpush1.xpose.msra.mxu1 %v6316_v47  ;;  %3226 = vmatmul.mubr.f32.vlgmr.msra.gmra.mrb[38].mxu0 %v6335_v60 }
  0x89   :  { %3300 = vmatprep.mubr.f32.mxu1 %v6342_v5  ;;  %3316 = vmatpush1.xpose.msra.mxu0 %v6349_v4 }
  0x8a   :  { %3388 = vmatprep.subr.mxu1 %v6308_v42  ;;  %3380 = vmatprep.mubr.f32.mxu0 %v6308_v42 }
  0x8b   :  { %3304 = vmatmul.mubr.f32.vlgmr.msra.gmra.mrb[38].mxu1 %v6349_v4  ;;  %3462 = vmatprep.subr.mxu0 %v6357_v9 }
  0x8c   :  { %3390 = vmatpush1.xpose.msra.mxu1 %v6316_v47  ;;  %3382 = vmatmul.mubr.f32.vlgmr.msra.gmra.mrb[40].mxu0 %v6316_v47 }
  0x8d   :  { %3454 = vmatprep.mubr.f32.mxu1 %v6308_v42  ;;  %3464 = vmatpush1.xpose.msra.mxu0 %v6365_v23 }
  0x8e   :  { %3548 = vmatprep.subr.mxu1 %v6415_v56  ;;  %3532 = vmatprep.mubr.f32.mxu0 %v6415_v56 }
  0x8f   :  { %3456 = vmatmul.mubr.f32.vlgmr.msra.gmra.mrb[40].mxu1 %v6316_v47  ;;  %3627 = vmatprep.subr.mxu0 %v6374_v38 }
  0x90   :  { %3554 = vmatpush1.xpose.msra.mxu1 %v6421_v54  ;;  %3538 = vmatmul.mubr.f32.vlgmr.msra.gmra.mrb[42].mxu0 %v6421_v54 }
  0x91   :  { %3618 = vmatprep.mubr.f32.mxu1 %v6357_v9  ;;  %3630 = vmatpush1.xpose.msra.mxu0 %v6383_v46 }
  0x92   :  { %3704 = vmatprep.subr.mxu1 %v6357_v9  ;;  %3695 = vmatprep.mubr.f32.mxu0 %v6374_v38 }
  0x93   :  { %3620 = vmatmul.mubr.f32.vlgmr.msra.gmra.mrb[42].mxu1 %v6365_v23  ;;  %3784 = vmatprep.subr.mxu0 %v6390_v0 }
  0x94   :  { %3706 = vmatpush1.xpose.msra.mxu1 %v6365_v23  ;;  %3698 = vmatmul.mubr.f32.vlgmr.msra.gmra.mrb[44].mxu0 %v6383_v46 }
  0x95   :  { %3772 = vmatprep.mubr.f32.mxu1 %v6390_v0  ;;  %3788 = vmatpush1.xpose.msra.mxu0 %v6397_v57 }
  0x96   :  { %3860 = vmatprep.subr.mxu1 %v6357_v9  ;;  %3852 = vmatprep.mubr.f32.mxu0 %v6357_v9 }
  0x97   :  { %3776 = vmatmul.mubr.f32.vlgmr.msra.gmra.mrb[44].mxu1 %v6397_v57  ;;  %3937 = vmatprep.subr.mxu0 %v6210_v58 }
  0x98   :  { %3862 = vmatpush1.xpose.msra.mxu1 %v6365_v23  ;;  %3854 = vmatmul.mubr.f32.vlgmr.msra.gmra.mrb[46].mxu0 %v6365_v23 }
  0x99   :  { %3926 = vmatprep.mubr.f32.mxu1 %v6357_v9  ;;  %3939 = vmatpush1.xpose.msra.mxu0 %v6218_v61 }
  0x9a   :  { %4023 = vmatprep.subr.mxu1 %v6273_v18  ;;  %4007 = vmatprep.mubr.f32.mxu0 %v6095_v27 }
  0x9b   :  { %3928 = vmatmul.mubr.f32.vlgmr.msra.gmra.mrb[46].mxu1 %v6365_v23  ;;  %4102 = vmatprep.subr.mxu0 %v6227_v63 }
  0x9c   :  { %4029 = vmatpush1.xpose.msra.mxu1 %v6283_v24  ;;  %4013 = vmatmul.mubr.f32.vlgmr.msra.gmra.mrb[48].mxu0 %v6090_v25 }
  0x9d   :  { %4093 = vmatprep.mubr.f32.mxu1 %v6060_v12  ;;  %4105 = vmatpush1.xpose.msra.mxu0 %v6237_v2 }
  0x9e   :  { %4179 = vmatprep.subr.mxu1 %v6210_v58  ;;  %4170 = vmatprep.mubr.f32.mxu0 %v6067_v15 }
  0x9f   :  { %4095 = vmatmul.mubr.f32.vlgmr.msra.gmra.mrb[48].mxu1 %v6057_v10  ;;  %4259 = vmatprep.subr.mxu0 %v6244_v3 }
  0xa0   :  { %4181 = vmatpush1.xpose.msra.mxu1 %v6218_v61  ;;  %4173 = vmatmul.mubr.f32.vlgmr.msra.gmra.mrb[50].mxu0 %v6063_v13  ;;  %v6596_v13 = vld [vmem:[#allocation16_spill] sm:$0xff] }
  0xa1   :  { %4247 = vmatprep.mubr.f32.mxu1 %v6079_v20  ;;  %4263 = vmatpush1.xpose.msra.mxu0 %v6251_v6 }
  0xa2   :  { %4335 = vmatprep.subr.mxu1 %v6210_v58  ;;  %4327 = vmatprep.mubr.f32.mxu0 %v6060_v12 }
  0xa3   :  { %4251 = vmatmul.mubr.f32.vlgmr.msra.gmra.mrb[50].mxu1 %v6070_v16  ;;  %4409 = vmatprep.subr.mxu0 %v6259_v8 }
  0xa4   :  { %4337 = vmatpush1.xpose.msra.mxu1 %v6218_v61  ;;  %4329 = vmatmul.mubr.f32.vlgmr.msra.gmra.mrb[52].mxu0 %v6057_v10 }
  0xa5   :  { %4401 = vmatprep.mubr.f32.mxu1 %v6060_v12  ;;  %4411 = vmatpush1.xpose.msra.mxu0 %v6267_v14  ;;  %v6595_v12 = vld [vmem:[#allocation15_spill] sm:$0xff] }
  0xa6   :  { %4495 = vmatprep.subr.mxu1 %v6322_v51  ;;  %4479 = vmatprep.mubr.f32.mxu0 %v6126_v36 }
  0xa7   :  { %4403 = vmatmul.mubr.f32.vlgmr.msra.gmra.mrb[52].mxu1 %v6057_v10  ;;  %4574 = vmatprep.subr.mxu0 %v6276_v21  ;;  %v6001_v10 = vmov 0.0  }
  0xa8   :  { %4501 = vmatpush1.xpose.msra.mxu1 %v6332_v59  ;;  %4485 = vmatmul.mubr.f32.vlgmr.msra.gmra.mrb[54].mxu0 %v6136_v39  ;;  %57 = vst.msk [vmem:[#allocation7] sm:$0x3] %vm56_vm0, %v6001_v10  ;;  %58 = vst.msk [vmem:[#allocation8] sm:$0x3] %vm56_vm0, %v6001_v10 }
  0xa9   :  { %4565 = vmatprep.mubr.f32.mxu1 %v6073_v17  ;;  %4577 = vmatpush1.xpose.msra.mxu0 %v6286_v29  ;;  %59 = vst.msk [vmem:[#allocation10] sm:$0x3] %vm56_vm0, %v6001_v10 }
  0xaa   :  { %4651 = vmatprep.subr.mxu1 %v6259_v8  ;;  %4642 = vmatprep.mubr.f32.mxu0 %v6085_v22 }
  0xab   :  { %4567 = vmatmul.mubr.f32.vlgmr.msra.gmra.mrb[54].mxu1 %v6076_v19  ;;  %4731 = vmatprep.subr.mxu0 %v6293_v31 }
  0xac   :  { %4653 = vmatpush1.xpose.msra.mxu1 %v6267_v14  ;;  %4645 = vmatmul.mubr.f32.vlgmr.msra.gmra.mrb[56].mxu0 %v6093_v26 }
  0xad   :  { %4719 = vmatprep.mubr.f32.mxu1 %v6098_v28  ;;  %4735 = vmatpush1.xpose.msra.mxu0 %v6300_v34 }
  0xae   :  { %4807 = vmatprep.subr.mxu1 %v6259_v8  ;;  %4799 = vmatprep.mubr.f32.mxu0 %v6073_v17 }
  0xaf   :  { %4723 = vmatmul.mubr.f32.vlgmr.msra.gmra.mrb[56].mxu1 %v6105_v30  ;;  %4881 = vmatprep.subr.mxu0 %v6308_v42 }
  0xb0   :  { %4809 = vmatpush1.xpose.msra.mxu1 %v6267_v14  ;;  %4801 = vmatmul.mubr.f32.vlgmr.msra.gmra.mrb[58].mxu0 %v6076_v19 }
  0xb1   :  { %4873 = vmatprep.mubr.f32.mxu1 %v6073_v17  ;;  %4883 = vmatpush1.xpose.msra.mxu0 %v6316_v47 }
  0xb2   :  { %4967 = vmatprep.subr.mxu1 %v6371_v33  ;;  %4951 = vmatprep.mubr.f32.mxu0 %v6175_v49 }
  0xb3   :  { %4875 = vmatmul.mubr.f32.vlgmr.msra.gmra.mrb[58].mxu1 %v6076_v19  ;;  %5046 = vmatprep.subr.mxu0 %v6325_v55 }
  0xb4   :  { %4973 = vmatpush1.xpose.msra.mxu1 %v6380_v44  ;;  %4957 = vmatmul.mubr.f32.vlgmr.msra.gmra.mrb[60].mxu0 %v6185_v52 }
  0xb5   :  { %5037 = vmatprep.mubr.f32.mxu1 %v6113_v32  ;;  %5049 = vmatpush1.xpose.msra.mxu0 %v6335_v60 }
  0xb6   :  { %5123 = vmatprep.subr.mxu1 %v6308_v42  ;;  %5114 = vmatprep.mubr.f32.mxu0 %v6129_v37 }
  0xb7   :  { %5039 = vmatmul.mubr.f32.vlgmr.msra.gmra.mrb[60].mxu1 %v6120_v35  ;;  %5203 = vmatprep.subr.mxu0 %v6342_v5 }
  0xb8   :  { %5125 = vmatpush1.xpose.msra.mxu1 %v6316_v47  ;;  %5117 = vmatmul.mubr.f32.vlgmr.msra.gmra.mrb[62].mxu0 %v6139_v40 }
  0xb9   :  { %5191 = vmatprep.mubr.f32.mxu1 %v6146_v41  ;;  %5207 = vmatpush1.xpose.msra.mxu0 %v6349_v4 }
  0xba   :  { %5279 = vmatprep.subr.mxu1 %v6308_v42  ;;  %5271 = vmatprep.mubr.f32.mxu0 %v6113_v32 }
  0xbb   :  { %5195 = vmatmul.mubr.f32.vlgmr.msra.gmra.mrb[62].mxu1 %v6153_v43  ;;  %5353 = vmatprep.subr.mxu0 %v6357_v9 }
  0xbc   :  { %5281 = vmatpush1.xpose.msra.mxu1 %v6316_v47  ;;  %5273 = vmatmul.mubr.f32.vlgmr.msra.gmra.mrb[64].mxu0 %v6120_v35 }
  0xbd   :  { %5345 = vmatprep.mubr.f32.mxu1 %v6113_v32  ;;  %5355 = vmatpush1.xpose.msra.mxu0 %v6365_v23 }
  0xbe   :  { %5439 = vmatprep.subr.mxu1 %v6415_v56  ;;  %5423 = vmatprep.mubr.f32.mxu0 %v6224_v62 }
  0xbf   :  { %5347 = vmatmul.mubr.f32.vlgmr.msra.gmra.mrb[64].mxu1 %v6120_v35  ;;  %5518 = vmatprep.subr.mxu0 %v6374_v38 }
  0xc0   :  { %5445 = vmatpush1.xpose.msra.mxu1 %v6421_v54  ;;  %5429 = vmatmul.mubr.f32.vlgmr.msra.gmra.mrb[66].mxu0 %v6234_v1 }
  0xc1   :  { %5509 = vmatprep.mubr.f32.mxu1 %v6161_v45  ;;  %5521 = vmatpush1.xpose.msra.mxu0 %v6383_v46 }
  0xc2   :  { %5595 = vmatprep.subr.mxu1 %v6357_v9  ;;  %5586 = vmatprep.mubr.f32.mxu0 %v6178_v50 }
  0xc3   :  { %5511 = vmatmul.mubr.f32.vlgmr.msra.gmra.mrb[66].mxu1 %v6169_v48  ;;  %5675 = vmatprep.subr.mxu0 %v6390_v0 }
  0xc4   :  { %5597 = vmatpush1.xpose.msra.mxu1 %v6365_v23  ;;  %5589 = vmatmul.mubr.f32.vlgmr.msra.gmra.mrb[68].mxu0 %v6188_v53 }
  0xc5   :  { %5663 = vmatprep.mubr.f32.mxu1 %v6595_v12  ;;  %5679 = vmatpush1.xpose.msra.mxu0 %v6397_v57 }
  0xc6   :  { %5751 = vmatprep.subr.mxu1 %v6357_v9  ;;  %5743 = vmatprep.mubr.f32.mxu0 %v6161_v45 }
  0xc7   :  { %5667 = vmatmul.mubr.f32.vlgmr.msra.gmra.mrb[68].mxu1 %v6596_v13 }
  0xc8   :  { %5753 = vmatpush1.xpose.msra.mxu1 %v6365_v23  ;;  %5745 = vmatmul.mubr.f32.vlgmr.msra.gmra.mrb[70].mxu0 %v6169_v48 }
  0xc9   :  { %5817 = vmatprep.mubr.f32.mxu1 %v6161_v45 }
  0xcb   :  { %5819 = vmatmul.mubr.f32.vlgmr.msra.gmra.mrb[70].mxu1 %v6169_v48 }
 0x10f   :  { %v187_v15 = vpop.f32.mrb[0].mxu0 }
 0x110   :  { %v189_v16 = vpop.f32.mrb[1].mxu0 }
 0x112   :  { %v269_v17 = vpop.f32.mrb[0].mxu1 }
 0x113   :  { %v270_v19 = vadd.f32 %v269_v17, %v187_v15  ;;  %v271_v20 = vpop.f32.mrb[1].mxu1  ;;  %v347_v22 = vpop.f32.mrb[2].mxu0 }
 0x114   :  { %v349_v25 = vpop.f32.mrb[3].mxu0  ;;  %v64_v20 = vld [vmem:[#allocation7] sm:$0x3] }
 0x115   :  { %v348_v26 = vadd.f32 %v347_v22, %v270_v19 }
 0x116   :  { %v425_v27 = vpop.f32.mrb[2].mxu1 }
 0x117   :  { %v426_v28 = vadd.f32 %v425_v27, %v348_v26  ;;  %v427_v30 = vpop.f32.mrb[3].mxu1  ;;  %v503_v32 = vpop.f32.mrb[4].mxu0 }
 0x118   :  { %v505_v35 = vpop.f32.mrb[5].mxu0 }
 0x119   :  { %v504_v36 = vadd.f32 %v503_v32, %v426_v28 }
 0x11a   :  { %v577_v37 = vpop.f32.mrb[4].mxu1 }
 0x11b   :  { %v578_v39 = vadd.f32 %v577_v37, %v504_v36  ;;  %v579_v40 = vpop.f32.mrb[5].mxu1  ;;  %v659_v41 = vpop.f32.mrb[6].mxu0 }
 0x11c   :  { %v661_v43 = vpop.f32.mrb[7].mxu0 }
 0x11d   :  { %v660_v45 = vadd.f32 %v659_v41, %v578_v39 }
 0x11e   :  { %v741_v48 = vpop.f32.mrb[6].mxu1 }
 0x11f   :  { %v742_v49 = vadd.f32 %v741_v48, %v660_v45  ;;  %v743_v50 = vpop.f32.mrb[7].mxu1  ;;  %v819_v52 = vpop.f32.mrb[8].mxu0 }
 0x120   :  { %v821_v53 = vpop.f32.mrb[9].mxu0 }
 0x121   :  { %v820_v54 = vadd.f32 %v819_v52, %v742_v49 }
 0x122   :  { %v897_v56 = vpop.f32.mrb[8].mxu1 }
 0x123   :  { %v898_v58 = vadd.f32 %v897_v56, %v820_v54  ;;  %v899_v61 = vpop.f32.mrb[9].mxu1  ;;  %v975_v62 = vpop.f32.mrb[10].mxu0 }
 0x124   :  { %v977_v63 = vpop.f32.mrb[11].mxu0 }
 0x125   :  { %v976_v1 = vadd.f32 %v975_v62, %v898_v58 }
 0x126   :  { %v1049_v2 = vpop.f32.mrb[10].mxu1 }
 0x127   :  { %v1050_v3 = vadd.f32 %v1049_v2, %v976_v1  ;;  %v1051_v6 = vpop.f32.mrb[11].mxu1  ;;  %v1131_v8 = vpop.f32.mrb[12].mxu0 }
 0x128   :  { %v1133_v14 = vpop.f32.mrb[13].mxu0 }
 0x129   :  { %v1132_v18 = vadd.f32 %v1131_v8, %v1050_v3 }
 0x12a   :  { %v1213_v21 = vpop.f32.mrb[12].mxu1 }
 0x12b   :  { %v1214_v24 = vadd.f32 %v1213_v21, %v1132_v18  ;;  %v1215_v29 = vpop.f32.mrb[13].mxu1  ;;  %v1291_v31 = vpop.f32.mrb[14].mxu0 }
 0x12c   :  { %v1293_v34 = vpop.f32.mrb[15].mxu0 }
 0x12d   :  { %v1292_v42 = vadd.f32 %v1291_v31, %v1214_v24 }
 0x12e   :  { %v1369_v47 = vpop.f32.mrb[14].mxu1 }
 0x12f   :  { %v1370_v51 = vadd.f32 %v1369_v47, %v1292_v42  ;;  %v1371_v55 = vpop.f32.mrb[15].mxu1  ;;  %v1447_v59 = vpop.f32.mrb[16].mxu0 }
 0x130   :  { %v1449_v60 = vpop.f32.mrb[17].mxu0 }
 0x131   :  { %v1448_v5 = vadd.f32 %v1447_v59, %v1370_v51 }
 0x132   :  { %v1521_v4 = vpop.f32.mrb[16].mxu1 }
 0x133   :  { %v1522_v9 = vadd.f32 %v1521_v4, %v1448_v5  ;;  %v1523_v23 = vpop.f32.mrb[17].mxu1  ;;  %v1603_v33 = vpop.f32.mrb[18].mxu0 }
 0x134   :  { %v1605_v38 = vpop.f32.mrb[19].mxu0 }
 0x135   :  { %v1604_v44 = vadd.f32 %v1603_v33, %v1522_v9 }
 0x136   :  { %v1685_v46 = vpop.f32.mrb[18].mxu1 }
 0x137   :  { %v1686_v0 = vadd.f32 %v1685_v46, %v1604_v44  ;;  %v1687_v57 = vpop.f32.mrb[19].mxu1  ;;  %v1763_v7 = vpop.f32.mrb[20].mxu0 }
 0x138   :  { %v1765_v11 = vpop.f32.mrb[21].mxu0 }
 0x139   :  { %v1764_v10 = vadd.f32 %v1763_v7, %v1686_v0 }
 0x13a   :  { %v1841_v12 = vpop.f32.mrb[20].mxu1 }
 0x13b   :  { %v1842_v13 = vadd.f32 %v1841_v12, %v1764_v10  ;;  %v1843_v15 = vpop.f32.mrb[21].mxu1  ;;  %v1919_v16 = vpop.f32.mrb[22].mxu0 }
 0x13c   :  { %v1921_v17 = vpop.f32.mrb[23].mxu0 }
 0x13d   :  { %v1920_v19 = vadd.f32 %v1919_v16, %v1842_v13 }
 0x13e   :  { %v1993_v22 = vpop.f32.mrb[22].mxu1 }
 0x13f   :  { %v1994_v25 = vadd.f32 %v1993_v22, %v1920_v19  ;;  %v1995_v26 = vpop.f32.mrb[23].mxu1  ;;  %v2123_v27 = vpop.f32.mrb[24].mxu0 }
 0x140   :  { %v2125_v28 = vpop.f32.mrb[25].mxu0 }
 0x141   :  { %v1997_v30 = vadd.f32 %v1994_v25, %v64_v20 }
 0x142   :  { %v2205_v32 = vpop.f32.mrb[24].mxu1 }
 0x143   :  { %1999 = vst.msk [vmem:[#allocation7] sm:$0x3] %vm56_vm0, %v1997_v30  ;;  %v2206_v35 = vadd.f32 %v2205_v32, %v2123_v27  ;;  %v2207_v36 = vpop.f32.mrb[25].mxu1  ;;  %v2283_v37 = vpop.f32.mrb[26].mxu0 }
 0x144   :  { %v2285_v39 = vpop.f32.mrb[27].mxu0 }
 0x145   :  { %5935 = shalt.err (!%p5932_p6)
}
 0x146   :  { %s5936_s16 = scalar_lea.hbm %s6588_s2, 32 }
 0x147   :  { %p5937_p7 = scmp.ne.s32.totalorder %s6588_s2, %s5936_s16  ;;  %p5940_p8 = scmp.lt.u32.totalorder %s5936_s16, %s6588_s2 }
 0x149   :  { %p5942_p9 = pnand %p5940_p8, %p5937_p7 }
 0x14b   :  { %5945 = shalt.err (!%p5942_p9)
}
 0x14c   :  { %5835 = dma.vmem_to_hbm [thread:$0]  %s5833_s12, 32, %s6588_s2, [#allocation4]   ;;  %v2284_v40 = vadd.f32 %v2283_v37, %v2206_v35  ;;  %v2361_v41 = vpop.f32.mrb[26].mxu1  ;;  %v2439_v48 = vpop.f32.mrb[28].mxu0  ;;  %v2000_v36 = vld [vmem:[#allocation8] sm:$0x3] }
 0x14d   :  { %v2363_v45 = vpop.f32.mrb[27].mxu1  ;;  %v2441_v49 = vpop.f32.mrb[29].mxu0  ;;  %s6003_s2 = smov [#allocation8]  }
 0x14e   :  { %v2362_v43 = vadd.f32 %v2361_v41, %v2284_v40  ;;  %v2513_v52 = vpop.f32.mrb[28].mxu1  ;;  %v2595_v56 = vpop.f32.mrb[30].mxu0  ;;  %s5842_s23 = sshll.u32 %s6003_s2, 4  ;;  %s5843_s23 = int_to_ptr.vmem [resolvable:$true] %s5842_s23 }
 0x14f   :  { %v2515_v54 = vpop.f32.mrb[29].mxu1  ;;  %v2597_v58 = vpop.f32.mrb[31].mxu0  ;;  %s5946_s24 = scalar_lea.vmem %s5843_s23, 32  ;;  %p5951_p11 = scmp.lt.s32.totalorder %s5843_s23, %s5843_s23 }
 0x150   :  { %v2440_v50 = vadd.f32 %v2439_v48, %v2362_v43  ;;  %v2677_v62 = vpop.f32.mrb[30].mxu1  ;;  %v2755_v2 = vpop.f32.mrb[32].mxu0  ;;  %p5947_p10 = scmp.ne.s32.totalorder %s5843_s23, %s5946_s24  ;;  %p5952_p12 = scmp.lt.s32.totalorder %s5946_s24, %s5946_s24 }
 0x151   :  { %v2679_v1 = vpop.f32.mrb[31].mxu1  ;;  %v2757_v3 = vpop.f32.mrb[33].mxu0 }
 0x152   :  { %v2514_v53 = vadd.f32 %v2513_v52, %v2440_v50  ;;  %v2833_v8 = vpop.f32.mrb[32].mxu1  ;;  %p5953_p13 = por %p5952_p12, %p5951_p11 }
 0x153   :  { %v2835_v18 = vpop.f32.mrb[33].mxu1  ;;  %v2911_v21 = vpop.f32.mrb[34].mxu0 }
 0x154   :  { %v2596_v61 = vadd.f32 %v2595_v56, %v2514_v53  ;;  %v2913_v24 = vpop.f32.mrb[35].mxu0  ;;  %p5954_p0 = pnand %p5953_p13, %p5947_p10 }
 0x156   :  { %v2678_v63 = vadd.f32 %v2677_v62, %v2596_v61  ;;  %v2985_v31 = vpop.f32.mrb[34].mxu1 }
 0x157   :  { %v2987_v42 = vpop.f32.mrb[35].mxu1  ;;  %v3067_v47 = vpop.f32.mrb[36].mxu0 }
 0x158   :  { %v2756_v6 = vadd.f32 %v2755_v2, %v2678_v63  ;;  %v3069_v51 = vpop.f32.mrb[37].mxu0 }
 0x15a   :  { %v2834_v14 = vadd.f32 %v2833_v8, %v2756_v6  ;;  %v3149_v59 = vpop.f32.mrb[36].mxu1 }
 0x15b   :  { %v3151_v5 = vpop.f32.mrb[37].mxu1  ;;  %v3227_v4 = vpop.f32.mrb[38].mxu0 }
 0x15c   :  { %v2912_v29 = vadd.f32 %v2911_v21, %v2834_v14  ;;  %v3229_v9 = vpop.f32.mrb[39].mxu0 }
 0x15e   :  { %v2986_v34 = vadd.f32 %v2985_v31, %v2912_v29  ;;  %v3305_v33 = vpop.f32.mrb[38].mxu1 }
 0x15f   :  { %v3307_v44 = vpop.f32.mrb[39].mxu1  ;;  %v3383_v46 = vpop.f32.mrb[40].mxu0 }
 0x160   :  { %v3068_v55 = vadd.f32 %v3067_v47, %v2986_v34  ;;  %v3385_v0 = vpop.f32.mrb[41].mxu0 }
 0x162   :  { %v3150_v60 = vadd.f32 %v3149_v59, %v3068_v55  ;;  %v3457_v7 = vpop.f32.mrb[40].mxu1 }
 0x163   :  { %v3459_v10 = vpop.f32.mrb[41].mxu1  ;;  %v3539_v12 = vpop.f32.mrb[42].mxu0 }
 0x164   :  { %v3228_v23 = vadd.f32 %v3227_v4, %v3150_v60  ;;  %v3541_v13 = vpop.f32.mrb[43].mxu0 }
 0x166   :  { %v3306_v38 = vadd.f32 %v3305_v33, %v3228_v23  ;;  %v3621_v16 = vpop.f32.mrb[42].mxu1 }
 0x167   :  { %v3623_v19 = vpop.f32.mrb[43].mxu1  ;;  %v3699_v20 = vpop.f32.mrb[44].mxu0 }
 0x168   :  { %v3384_v57 = vadd.f32 %v3383_v46, %v3306_v38  ;;  %v3701_v22 = vpop.f32.mrb[45].mxu0 }
 0x16a   :  { %v3458_v11 = vadd.f32 %v3457_v7, %v3384_v57  ;;  %v3777_v26 = vpop.f32.mrb[44].mxu1 }
 0x16b   :  { %v3779_v28 = vpop.f32.mrb[45].mxu1  ;;  %v3855_v30 = vpop.f32.mrb[46].mxu0 }
 0x16c   :  { %v3540_v15 = vadd.f32 %v3539_v12, %v3458_v11  ;;  %v3857_v32 = vpop.f32.mrb[47].mxu0 }
 0x16e   :  { %v3622_v17 = vadd.f32 %v3621_v16, %v3540_v15  ;;  %v3929_v37 = vpop.f32.mrb[46].mxu1 }
 0x16f   :  { %v3931_v40 = vpop.f32.mrb[47].mxu1  ;;  %v4014_v41 = vpop.f32.mrb[48].mxu0 }
 0x170   :  { %v3700_v25 = vadd.f32 %v3699_v20, %v3622_v17  ;;  %v4016_v43 = vpop.f32.mrb[49].mxu0 }
 0x172   :  { %v3778_v27 = vadd.f32 %v3777_v26, %v3700_v25  ;;  %v4096_v48 = vpop.f32.mrb[48].mxu1 }
 0x173   :  { %v4097_v49 = vadd.f32 %v4096_v48, %v4014_v41  ;;  %v4098_v50 = vpop.f32.mrb[49].mxu1  ;;  %v4174_v52 = vpop.f32.mrb[50].mxu0 }
 0x174   :  { %v3856_v35 = vadd.f32 %v3855_v30, %v3778_v27  ;;  %v4176_v53 = vpop.f32.mrb[51].mxu0 }
 0x176   :  { %v3930_v39 = vadd.f32 %v3929_v37, %v3856_v35 }
 0x178   :  { %v3933_v45 = vadd.f32 %v3930_v39, %v2000_v36 }
 0x17a   :  { %3934 = vst.msk [vmem:[#allocation8] sm:$0x3] %vm56_vm0, %v3933_v45 }
 0x17b   :  { %5957 = shalt.err (!%p5954_p0)
}
 0x17c   :  { %s5958_s27 = scalar_lea.hbm %s6589_s3, 32 }
 0x17d   :  { %p5959_p1 = scmp.ne.s32.totalorder %s6589_s3, %s5958_s27  ;;  %p5962_p2 = scmp.lt.u32.totalorder %s5958_s27, %s6589_s3 }
 0x17f   :  { %p5964_p3 = pnand %p5962_p2, %p5959_p1 }
 0x181   :  { %5967 = shalt.err (!%p5964_p3)
}
 0x182   :  { %5845 = dma.vmem_to_hbm [thread:$0]  %s5843_s23, 32, %s6589_s3, [#allocation9]   ;;  %v4175_v54 = vadd.f32 %v4174_v52, %v4097_v49  ;;  %v4252_v56 = vpop.f32.mrb[50].mxu1  ;;  %v4330_v62 = vpop.f32.mrb[52].mxu0  ;;  %v3935_v50 = vld [vmem:[#allocation10] sm:$0x3] }
 0x183   :  { %v4254_v61 = vpop.f32.mrb[51].mxu1  ;;  %v4332_v63 = vpop.f32.mrb[53].mxu0  ;;  %s6004_s3 = smov [#allocation10]  }
 0x184   :  { %v4253_v58 = vadd.f32 %v4252_v56, %v4175_v54  ;;  %v4404_v2 = vpop.f32.mrb[52].mxu1  ;;  %v4486_v8 = vpop.f32.mrb[54].mxu0  ;;  %s5852_s8 = sshll.u32 %s6004_s3, 4  ;;  %s5853_s8 = int_to_ptr.vmem [resolvable:$true] %s5852_s8 }
 0x185   :  { %v4406_v6 = vpop.f32.mrb[53].mxu1  ;;  %v4488_v14 = vpop.f32.mrb[55].mxu0  ;;  %s5968_s9 = scalar_lea.vmem %s5853_s8, 32  ;;  %p5973_p5 = scmp.lt.s32.totalorder %s5853_s8, %s5853_s8 }
 0x186   :  { %v4331_v1 = vadd.f32 %v4330_v62, %v4253_v58  ;;  %v4568_v21 = vpop.f32.mrb[54].mxu1  ;;  %v4646_v31 = vpop.f32.mrb[56].mxu0  ;;  %p5969_p4 = scmp.ne.s32.totalorder %s5853_s8, %s5968_s9  ;;  %p5974_p6 = scmp.lt.s32.totalorder %s5968_s9, %s5968_s9 }
 0x187   :  { %v4570_v29 = vpop.f32.mrb[55].mxu1  ;;  %v4648_v34 = vpop.f32.mrb[57].mxu0 }
 0x188   :  { %v4405_v3 = vadd.f32 %v4404_v2, %v4331_v1  ;;  %v4724_v47 = vpop.f32.mrb[56].mxu1  ;;  %v4802_v59 = vpop.f32.mrb[58].mxu0  ;;  %p5975_p7 = por %p5974_p6, %p5973_p5 }
 0x189   :  { %v4726_v55 = vpop.f32.mrb[57].mxu1  ;;  %v4804_v60 = vpop.f32.mrb[59].mxu0 }
 0x18a   :  { %v4487_v18 = vadd.f32 %v4486_v8, %v4405_v3  ;;  %v4876_v4 = vpop.f32.mrb[58].mxu1  ;;  %v4958_v33 = vpop.f32.mrb[60].mxu0  ;;  %p5976_p8 = pnand %p5975_p7, %p5969_p4 }
 0x18b   :  { %v4878_v23 = vpop.f32.mrb[59].mxu1  ;;  %v4960_v38 = vpop.f32.mrb[61].mxu0 }
 0x18c   :  { %v4569_v24 = vadd.f32 %v4568_v21, %v4487_v18  ;;  %v5040_v46 = vpop.f32.mrb[60].mxu1  ;;  %v5118_v7 = vpop.f32.mrb[62].mxu0 }
 0x18d   :  { %v5042_v57 = vpop.f32.mrb[61].mxu1  ;;  %v5120_v11 = vpop.f32.mrb[63].mxu0 }
 0x18e   :  { %v4647_v42 = vadd.f32 %v4646_v31, %v4569_v24  ;;  %v5196_v12 = vpop.f32.mrb[62].mxu1 }
 0x18f   :  { %v5198_v15 = vpop.f32.mrb[63].mxu1  ;;  %v5274_v16 = vpop.f32.mrb[64].mxu0 }
 0x190   :  { %v4725_v51 = vadd.f32 %v4724_v47, %v4647_v42  ;;  %v5276_v17 = vpop.f32.mrb[65].mxu0 }
 0x192   :  { %v4803_v5 = vadd.f32 %v4802_v59, %v4725_v51  ;;  %v5348_v20 = vpop.f32.mrb[64].mxu1 }
 0x193   :  { %v5350_v25 = vpop.f32.mrb[65].mxu1  ;;  %v5430_v26 = vpop.f32.mrb[66].mxu0 }
 0x194   :  { %v4877_v9 = vadd.f32 %v4876_v4, %v4803_v5  ;;  %v5432_v27 = vpop.f32.mrb[67].mxu0 }
 0x196   :  { %v4959_v44 = vadd.f32 %v4958_v33, %v4877_v9  ;;  %v5512_v30 = vpop.f32.mrb[66].mxu1 }
 0x197   :  { %v5514_v35 = vpop.f32.mrb[67].mxu1  ;;  %v5590_v36 = vpop.f32.mrb[68].mxu0 }
 0x198   :  { %v5041_v0 = vadd.f32 %v5040_v46, %v4959_v44  ;;  %v5592_v37 = vpop.f32.mrb[69].mxu0 }
 0x19a   :  { %v5119_v10 = vadd.f32 %v5118_v7, %v5041_v0  ;;  %v5668_v40 = vpop.f32.mrb[68].mxu1 }
 0x19b   :  { %v5670_v43 = vpop.f32.mrb[69].mxu1  ;;  %v5746_v45 = vpop.f32.mrb[70].mxu0 }
 0x19c   :  { %v5197_v13 = vadd.f32 %v5196_v12, %v5119_v10  ;;  %v5748_v48 = vpop.f32.mrb[71].mxu0 }
 0x19e   :  { %v5275_v19 = vadd.f32 %v5274_v16, %v5197_v13  ;;  %v5820_v52 = vpop.f32.mrb[70].mxu1 }
 0x19f   :  { %v5822_v54 = vpop.f32.mrb[71].mxu1 }
 0x1a0   :  { %v5349_v22 = vadd.f32 %v5348_v20, %v5275_v19 }
 0x1a2   :  { %v5431_v28 = vadd.f32 %v5430_v26, %v5349_v22 }
 0x1a4   :  { %v5513_v32 = vadd.f32 %v5512_v30, %v5431_v28 }
 0x1a6   :  { %v5591_v39 = vadd.f32 %v5590_v36, %v5513_v32 }
 0x1a8   :  { %v5669_v41 = vadd.f32 %v5668_v40, %v5591_v39 }
 0x1aa   :  { %v5747_v49 = vadd.f32 %v5746_v45, %v5669_v41 }
 0x1ac   :  { %v5821_v53 = vadd.f32 %v5820_v52, %v5747_v49 }
 0x1ae   :  { %v5824_v56 = vadd.f32 %v5821_v53, %v3935_v50 }
 0x1b0   :  { %5825 = vst.msk [vmem:[#allocation10] sm:$0x3] %vm56_vm0, %v5824_v56 }
 0x1b1   :  { %5979 = shalt.err (!%p5976_p8)
}
 0x1b2   :  { %s5980_s11 = scalar_lea.hbm %s6590_s4, 32 }
 0x1b3   :  { %p5981_p9 = scmp.ne.s32.totalorder %s6590_s4, %s5980_s11  ;;  %p5984_p10 = scmp.lt.u32.totalorder %s5980_s11, %s6590_s4 }
 0x1b5   :  { %p5986_p11 = pnand %p5984_p10, %p5981_p9 }
 0x1b7   :  { %5989 = shalt.err (!%p5986_p11)
}
 0x1b8   :  { %5855 = dma.vmem_to_hbm [thread:$0]  %s5853_s8, 32, %s6590_s4, [#allocation9]  }
 0x1b9   :  { %5994 = dma.done.wait [#allocation4], 32  }
 0x1ba   :  { %5995 = vsyncadd [#allocation4], 4294967264 }
 0x1bb   :  { %5996 = dma.done.wait [#allocation9], 64  }
 0x1bc   :  { %5997 = vsyncadd [#allocation9], 4294967232 }
 0x1bd   :  { %5865 = vsyncpa [#allocation3], 1 }
 0x1be   :  { %5866 = vsyncpa [#allocation6], 1 }
 0x1bf   :  { %5867 = vsyncpa [#allocation4], 1 }
 0x1c0   :  { %5868 = vsyncpa [#allocation9], 1 }

</bundles_post_ra>
